<compile_context>
chip_gen: v7x
topology: tpu7x:2x2x1
jax: 0.10.0
libtpu: 0.0.40
codegen_flags: <defaults>
</compile_context>

<pallas_src>
import functools

import jax
import jax.numpy as jnp
from jax.experimental import pallas as pl
from jax.experimental.pallas import tpu as pltpu

NEG_SLOPE = 0.01  # torch.nn.functional.leaky_relu default
_PRECISION = jax.lax.Precision.HIGHEST


def _round_up(n, m):
    return (n + m - 1) // m * m


def _leaky_relu(h):
    return jnp.where(h > 0, h, NEG_SLOPE * h)


def policy_mlp_kernel(x_ref, w1_ref, w2_ref, w3_ref, w4_ref,
                      b1_ref, b2_ref, b3_ref, b4_ref, o_ref):
    # Shapes inside the kernel (TB = batch tile, features on sublanes,
    # batch on lanes):
    #   x_ref : (obs_pad, TB)
    #   w1    : (64, obs_pad)   w2: (64, 64)   w3: (32, 64)   w4: (act_pad, 32)
    #   bN    : (out_pad_N, 1)  pre-shaped column biases (broadcast over lanes)
    #   o_ref : (act_pad, TB)
    h = x_ref[...]

    def dense(w_ref, b_ref, h):
        return jnp.dot(w_ref[...], h,
                       preferred_element_type=jnp.float32,
                       precision=_PRECISION) + b_ref[...]

    h = _leaky_relu(dense(w1_ref, b1_ref, h))
    h = _leaky_relu(dense(w2_ref, b2_ref, h))
    h = _leaky_relu(dense(w3_ref, b3_ref, h))
    h = dense(w4_ref, b4_ref, h)

    o_ref[...] = h.astype(o_ref.dtype)


def init_params(key, observation_space, action_space):
    """Logical (unpadded) params in PyTorch Linear layout: W=(out,in), b=(out,)."""
    dims = [(observation_space, 64), (64, 64), (64, 32), (32, action_space)]
    params = {}
    for i, (fan_in, fan_out) in enumerate(dims, start=1):
        key, kw, kb = jax.random.split(key, 3)
        bound = 1.0 / jnp.sqrt(fan_in)  # torch.nn.Linear default init range
        params[f"w{i}"] = jax.random.uniform(
            kw, (fan_out, fan_in), jnp.float32, minval=-bound, maxval=bound)
        params[f"b{i}"] = jax.random.uniform(
            kb, (fan_out,), jnp.float32, minval=-bound, maxval=bound)
    return params


def pack_params(params, observation_space, action_space):
    """One-time repack: pad each feature dim independently to a multiple of 8
    (sublane granularity for f32), store weights as (out_pad, in_pad) and
    biases as (out_pad, 1) columns.  Padded rows/cols are zero, so padded
    activations stay exactly zero through leaky_relu.  Returns arrays only
    (safe to pass through jit)."""
    dims = [observation_space, 64, 64, 32, action_space]
    packed = {}
    for l in range(4):
        in_pad = _round_up(dims[l], 8)
        out_pad = _round_up(dims[l + 1], 8)
        w = params[f"w{l + 1}"]                      # (out, in)
        b = params[f"b{l + 1}"]                      # (out,)
        wp = jnp.zeros((out_pad, in_pad), jnp.float32)
        wp = wp.at[: w.shape[0], : w.shape[1]].set(w)
        bp = jnp.zeros((out_pad, 1), jnp.float32)
        bp = bp.at[: b.shape[0], 0].set(b)
        packed[f"w{l + 1}"] = wp
        packed[f"b{l + 1}"] = bp
    return packed


@functools.partial(
    jax.jit, static_argnames=("observation_space", "action_space", "max_tile_b"))
def policy_nn_forward(x, packed, *, observation_space, action_space,
                      max_tile_b=2048):
    """x: (batch, observation_space) f32.  packed: output of pack_params."""
    B = x.shape[0]
    # Padded sizes derived from (static) array shapes, not traced values.
    obs_pad = packed["w1"].shape[1]
    act_pad = packed["w4"].shape[0]

    # Batch tile: multiple of 128 (lane width), capped so large batches get
    # long DMAs, but ensure >=2 grid steps when B > 128 so the "parallel"
    # axis can shard across both TensorCores on v7x.
    tile_b = min(max_tile_b, _round_up(max(B, 1), 128))
    if B > 128:
        tile_b = min(tile_b, _round_up(pl.cdiv(B, 2), 128))
    b_pad = _round_up(B, tile_b)
    num_tiles = b_pad // tile_b

    # Small lane-dense (features, batch) slab: only obs_pad (=16 here) rows.
    xT = jnp.zeros((obs_pad, b_pad), jnp.float32).at[:observation_space, :B].set(x.T)

    x_spec = pl.BlockSpec((obs_pad, tile_b), lambda i: (0, i))
    o_spec = pl.BlockSpec((act_pad, tile_b), lambda i: (0, i))

    def resident(arr):  # full-array block, constant index_map -> stays in VMEM
        return pl.BlockSpec(arr.shape, lambda i: (0, 0))

    w_args = [packed[f"w{l}"] for l in range(1, 5)]
    b_args = [packed[f"b{l}"] for l in range(1, 5)]

    out = pl.pallas_call(
        policy_mlp_kernel,
        out_shape=jax.ShapeDtypeStruct((act_pad, b_pad), jnp.float32),
        grid=(num_tiles,),
        in_specs=[x_spec]
        + [resident(w) for w in w_args]
        + [resident(b) for b in b_args],
        out_specs=o_spec,
        compiler_params=pltpu.CompilerParams(
            dimension_semantics=("parallel",),      # shard batch tiles across TCs
            vmem_limit_bytes=48 * 1024 * 1024,      # safe on v7x's 64 MiB VMEM
        ),
    )(xT, *w_args, *b_args)

    # Slice padded rows/columns back to the logical (batch, action) output.
    return out[:action_space, :B].T


def reference_forward(x, params):
    h = x
    for i in range(1, 5):
        w = params[f"w{i}"]  # (out, in)
        b = params[f"b{i}"]
        h = jnp.dot(h, w.T, precision=_PRECISION) + b
        if i < 4:
            h = jnp.where(h > 0, h, NEG_SLOPE * h)
    return h


if __name__ == "__main__":
    observation_space = 16
    action_space = 8
    batch = 2  # NOTE: at batch this small, per-call launch overhead dominates;
    #            batch many env states per call in real rollouts.

    key = jax.random.PRNGKey(0)
    key, kx = jax.random.split(key)
    params = init_params(key, observation_space, action_space)
    x = jax.random.normal(kx, (batch, observation_space), dtype=jnp.float32)

    packed = pack_params(params, observation_space, action_space)

    out = policy_nn_forward(x, packed,
                            observation_space=observation_space,
                            action_space=action_space)
    out = jax.block_until_ready(out)

    ref = reference_forward(x, params)
    assert out.shape == (batch, action_space)
    assert jnp.allclose(out, ref, atol=1e-5, rtol=1e-5), "mismatch vs reference"

    print("KERNEL_OK")
</pallas_src>

<mosaic_0001>
module attributes {stable_mosaic.version = 11 : i64} {
  func.func @policy_mlp_kernel(%arg0: i32, %arg1: memref<16x128xf32, #tpu.memory_space<vmem>>, %arg2: memref<64x16xf32, #tpu.memory_space<vmem>>, %arg3: memref<64x64xf32, #tpu.memory_space<vmem>>, %arg4: memref<32x64xf32, #tpu.memory_space<vmem>>, %arg5: memref<8x32xf32, #tpu.memory_space<vmem>>, %arg6: memref<64x1xf32, #tpu.memory_space<vmem>>, %arg7: memref<64x1xf32, #tpu.memory_space<vmem>>, %arg8: memref<32x1xf32, #tpu.memory_space<vmem>>, %arg9: memref<8x1xf32, #tpu.memory_space<vmem>>, %arg10: memref<8x128xf32, #tpu.memory_space<vmem>>) attributes {dimension_semantics = [#tpu.dimension_semantics<parallel>], iteration_bounds = array<i64: 1>, scalar_prefetch = 0 : i64, scratch_operands = 0 : i64, tpu.core_type = #tpu.core_type<tc>, window_params = [{transform_indices = @transform_0, window_bounds = array<i64: 16, 128>}, {pipeline_mode = #tpu.pipeline_mode<synchronous>, transform_indices = @transform_1, window_bounds = array<i64: 64, 16>}, {pipeline_mode = #tpu.pipeline_mode<synchronous>, transform_indices = @transform_2, window_bounds = array<i64: 64, 64>}, {pipeline_mode = #tpu.pipeline_mode<synchronous>, transform_indices = @transform_3, window_bounds = array<i64: 32, 64>}, {pipeline_mode = #tpu.pipeline_mode<synchronous>, transform_indices = @transform_4, window_bounds = array<i64: 8, 32>}, {pipeline_mode = #tpu.pipeline_mode<synchronous>, transform_indices = @transform_5, window_bounds = array<i64: 64, 1>}, {pipeline_mode = #tpu.pipeline_mode<synchronous>, transform_indices = @transform_6, window_bounds = array<i64: 64, 1>}, {pipeline_mode = #tpu.pipeline_mode<synchronous>, transform_indices = @transform_7, window_bounds = array<i64: 32, 1>}, {pipeline_mode = #tpu.pipeline_mode<synchronous>, transform_indices = @transform_8, window_bounds = array<i64: 8, 1>}, {transform_indices = @transform_9, window_bounds = array<i64: 8, 128>}]} {
    %c0 = arith.constant 0 : index
    %c0_0 = arith.constant 0 : index
    %0 = vector.load %arg1[%c0, %c0_0] : memref<16x128xf32, #tpu.memory_space<vmem>>, vector<16x128xf32>
    %c0_1 = arith.constant 0 : index
    %c0_2 = arith.constant 0 : index
    %1 = vector.load %arg2[%c0_1, %c0_2] : memref<64x16xf32, #tpu.memory_space<vmem>>, vector<64x16xf32>
    %cst = arith.constant dense<0.000000e+00> : vector<64x128xf32>
    %2 = tpu.matmul %1, %0, %cst {dimension_numbers = #tpu.dot_dimension_numbers<[1], [0], [0], [1], [0, 0, 1, 1], [], []>, precision = #tpu.contract_precision<fp32>} : vector<64x16xf32>, vector<16x128xf32>, vector<64x128xf32> -> vector<64x128xf32>
    %c0_3 = arith.constant 0 : index
    %c0_4 = arith.constant 0 : index
    %3 = vector.load %arg6[%c0_3, %c0_4] : memref<64x1xf32, #tpu.memory_space<vmem>>, vector<64x1xf32>
    %4 = vector.broadcast %3 : vector<64x1xf32> to vector<64x128xf32>
    %5 = arith.addf %2, %4 : vector<64x128xf32>
    %cst_5 = arith.constant 0.000000e+00 : f32
    %6 = vector.broadcast %cst_5 : f32 to vector<64x128xf32>
    %7 = arith.cmpf ogt, %5, %6 : vector<64x128xf32>
    %cst_6 = arith.constant 0.00999999977 : f32
    %8 = vector.broadcast %cst_6 : f32 to vector<64x128xf32>
    %9 = arith.mulf %8, %5 : vector<64x128xf32>
    %10 = arith.select %7, %5, %9 : vector<64x128xi1>, vector<64x128xf32>
    %c0_7 = arith.constant 0 : index
    %c0_8 = arith.constant 0 : index
    %11 = vector.load %arg3[%c0_7, %c0_8] : memref<64x64xf32, #tpu.memory_space<vmem>>, vector<64x64xf32>
    %cst_9 = arith.constant dense<0.000000e+00> : vector<64x128xf32>
    %12 = tpu.matmul %11, %10, %cst_9 {dimension_numbers = #tpu.dot_dimension_numbers<[1], [0], [0], [1], [0, 0, 1, 1], [], []>, precision = #tpu.contract_precision<fp32>} : vector<64x64xf32>, vector<64x128xf32>, vector<64x128xf32> -> vector<64x128xf32>
    %c0_10 = arith.constant 0 : index
    %c0_11 = arith.constant 0 : index
    %13 = vector.load %arg7[%c0_10, %c0_11] : memref<64x1xf32, #tpu.memory_space<vmem>>, vector<64x1xf32>
    %14 = vector.broadcast %13 : vector<64x1xf32> to vector<64x128xf32>
    %15 = arith.addf %12, %14 : vector<64x128xf32>
    %cst_12 = arith.constant 0.000000e+00 : f32
    %16 = vector.broadcast %cst_12 : f32 to vector<64x128xf32>
    %17 = arith.cmpf ogt, %15, %16 : vector<64x128xf32>
    %cst_13 = arith.constant 0.00999999977 : f32
    %18 = vector.broadcast %cst_13 : f32 to vector<64x128xf32>
    %19 = arith.mulf %18, %15 : vector<64x128xf32>
    %20 = arith.select %17, %15, %19 : vector<64x128xi1>, vector<64x128xf32>
    %c0_14 = arith.constant 0 : index
    %c0_15 = arith.constant 0 : index
    %21 = vector.load %arg4[%c0_14, %c0_15] : memref<32x64xf32, #tpu.memory_space<vmem>>, vector<32x64xf32>
    %cst_16 = arith.constant dense<0.000000e+00> : vector<32x128xf32>
    %22 = tpu.matmul %21, %20, %cst_16 {dimension_numbers = #tpu.dot_dimension_numbers<[1], [0], [0], [1], [0, 0, 1, 1], [], []>, precision = #tpu.contract_precision<fp32>} : vector<32x64xf32>, vector<64x128xf32>, vector<32x128xf32> -> vector<32x128xf32>
    %c0_17 = arith.constant 0 : index
    %c0_18 = arith.constant 0 : index
    %23 = vector.load %arg8[%c0_17, %c0_18] : memref<32x1xf32, #tpu.memory_space<vmem>>, vector<32x1xf32>
    %24 = vector.broadcast %23 : vector<32x1xf32> to vector<32x128xf32>
    %25 = arith.addf %22, %24 : vector<32x128xf32>
    %cst_19 = arith.constant 0.000000e+00 : f32
    %26 = vector.broadcast %cst_19 : f32 to vector<32x128xf32>
    %27 = arith.cmpf ogt, %25, %26 : vector<32x128xf32>
    %cst_20 = arith.constant 0.00999999977 : f32
    %28 = vector.broadcast %cst_20 : f32 to vector<32x128xf32>
    %29 = arith.mulf %28, %25 : vector<32x128xf32>
    %30 = arith.select %27, %25, %29 : vector<32x128xi1>, vector<32x128xf32>
    %c0_21 = arith.constant 0 : index
    %c0_22 = arith.constant 0 : index
    %31 = vector.load %arg5[%c0_21, %c0_22] : memref<8x32xf32, #tpu.memory_space<vmem>>, vector<8x32xf32>
    %cst_23 = arith.constant dense<0.000000e+00> : vector<8x128xf32>
    %32 = tpu.matmul %31, %30, %cst_23 {dimension_numbers = #tpu.dot_dimension_numbers<[1], [0], [0], [1], [0, 0, 1, 1], [], []>, precision = #tpu.contract_precision<fp32>} : vector<8x32xf32>, vector<32x128xf32>, vector<8x128xf32> -> vector<8x128xf32>
    %c0_24 = arith.constant 0 : index
    %c0_25 = arith.constant 0 : index
    %33 = vector.load %arg9[%c0_24, %c0_25] : memref<8x1xf32, #tpu.memory_space<vmem>>, vector<8x1xf32>
    %34 = vector.broadcast %33 : vector<8x1xf32> to vector<8x128xf32>
    %35 = arith.addf %32, %34 : vector<8x128xf32>
    %c0_26 = arith.constant 0 : index
    %c0_27 = arith.constant 0 : index
    %36 = vector.load %arg10[%c0_26, %c0_27] : memref<8x128xf32, #tpu.memory_space<vmem>>, vector<8x128xf32>
    tpu.vector_store %arg10[%c0_26, %c0_27], %35 {strides = array<i32>} : memref<8x128xf32, #tpu.memory_space<vmem>>, vector<8x128xf32>,
    return
  }
  func.func @transform_0(%arg0: i32) -> (i32, i32) {
    %c0_i32 = arith.constant 0 : i32
    %c0_i32_0 = arith.constant 0 : i32
    return %c0_i32, %arg0 : i32, i32
  }
  func.func @transform_1(%arg0: i32) -> (i32, i32) {
    %c0_i32 = arith.constant 0 : i32
    %c0_i32_0 = arith.constant 0 : i32
    %c0_i32_1 = arith.constant 0 : i32
    return %c0_i32, %c0_i32_0 : i32, i32
  }
  func.func @transform_2(%arg0: i32) -> (i32, i32) {
    %c0_i32 = arith.constant 0 : i32
    %c0_i32_0 = arith.constant 0 : i32
    %c0_i32_1 = arith.constant 0 : i32
    return %c0_i32, %c0_i32_0 : i32, i32
  }
  func.func @transform_3(%arg0: i32) -> (i32, i32) {
    %c0_i32 = arith.constant 0 : i32
    %c0_i32_0 = arith.constant 0 : i32
    %c0_i32_1 = arith.constant 0 : i32
    return %c0_i32, %c0_i32_0 : i32, i32
  }
  func.func @transform_4(%arg0: i32) -> (i32, i32) {
    %c0_i32 = arith.constant 0 : i32
    %c0_i32_0 = arith.constant 0 : i32
    %c0_i32_1 = arith.constant 0 : i32
    return %c0_i32, %c0_i32_0 : i32, i32
  }
  func.func @transform_5(%arg0: i32) -> (i32, i32) {
    %c0_i32 = arith.constant 0 : i32
    %c0_i32_0 = arith.constant 0 : i32
    %c0_i32_1 = arith.constant 0 : i32
    return %c0_i32, %c0_i32_0 : i32, i32
  }
  func.func @transform_6(%arg0: i32) -> (i32, i32) {
    %c0_i32 = arith.constant 0 : i32
    %c0_i32_0 = arith.constant 0 : i32
    %c0_i32_1 = arith.constant 0 : i32
    return %c0_i32, %c0_i32_0 : i32, i32
  }
  func.func @transform_7(%arg0: i32) -> (i32, i32) {
    %c0_i32 = arith.constant 0 : i32
    %c0_i32_0 = arith.constant 0 : i32
    %c0_i32_1 = arith.constant 0 : i32
    return %c0_i32, %c0_i32_0 : i32, i32
  }
  func.func @transform_8(%arg0: i32) -> (i32, i32) {
    %c0_i32 = arith.constant 0 : i32
    %c0_i32_0 = arith.constant 0 : i32
    %c0_i32_1 = arith.constant 0 : i32
    return %c0_i32, %c0_i32_0 : i32, i32
  }
  func.func @transform_9(%arg0: i32) -> (i32, i32) {
    %c0_i32 = arith.constant 0 : i32
    %c0_i32_0 = arith.constant 0 : i32
    return %c0_i32, %arg0 : i32, i32
  }
}

</mosaic_0001>

<bundles_post_ra>
// kernel: policy_nn_forward.1
= control target key start
LH: loop header
LB: loop body
LE: loop exit
PB: predicated region body
PF: predicated region fallthrough
CT: control target
= control target key end

     0   :  { %vm90_vm0 = vcmask 130048   ;;  %v4169_v3 = vmov 0   ;;  %vm955_vm1 = vcmask 523264   ;;  %s4888_s0 = inlined_call_operand.vmem [shape: f32[16,128], index: 0, kind: input, shape index: {}]   ;;  %s4889_s1 = inlined_call_operand.vmem [shape: f32[64,16], index: 1, kind: input, shape index: {}]   ;;  %s4890_s5 = inlined_call_operand.vmem [shape: f32[64,1], index: 5, kind: input, shape index: {}]   ;;  %s4891_s6 = inlined_call_operand.vmem [shape: f32[64,1], index: 6, kind: input, shape index: {}]   ;;  %s4892_s7 = inlined_call_operand.vmem [shape: f32[32,1], index: 7, kind: input, shape index: {}]   ;;  %s4893_s8 = inlined_call_operand.vmem [shape: f32[8,1], index: 8, kind: input, shape index: {}]   ;;  %s4894_s2 = inlined_call_operand.vmem [shape: f32[64,64], index: 2, kind: input, shape index: {}]   ;;  %s4895_s3 = inlined_call_operand.vmem [shape: f32[32,64], index: 3, kind: input, shape index: {}]   ;;  %s4896_s4 = inlined_call_operand.vmem [shape: f32[8,32], index: 4, kind: input, shape index: {}]   ;;  %s4897_s9 = inlined_call_operand.vmem [shape: f32[8,128], index: 9, kind: output, shape index: {}]  }
   0x1   :  { %v32_v0 = vld [vmem:[%s4888_s0] sm:$0xff]  ;;  %v33_v1 = vld [vmem:[%s4888_s0 + $0x8] sm:$0xff]  ;;  %4167 = vset.pattern.permute.xlu0 %v4169_v3  ;;  %4168 = vset.pattern.permute.xlu1 %v4169_v3  ;;  %v36_v8 = vld [vmem:[%s4889_s1 + $0x10] sm:$0xff] }
   0x2   :  { %v34_v2 = vld [vmem:[%s4889_s1] sm:$0xff]  ;;  %v116_v4 = vand.u32 4294901760, %v32_v0  ;;  %v119_v5 = vand.u32 4294901760, %v33_v1  ;;  %v35_v7 = vld [vmem:[%s4889_s1 + $0x8] sm:$0xff]  ;;  %v37_v9 = vld [vmem:[%s4889_s1 + $0x18] sm:$0xff]  ;;  %v98_v16 = vsel %vm90_vm0, %v36_v8, 0 }
   0x3   :  { %v92_v6 = vsel %vm90_vm0, %v34_v2, 0  ;;  %v95_v11 = vsel %vm90_vm0, %v35_v7, 0  ;;  %v38_v12 = vld [vmem:[%s4889_s1 + $0x20] sm:$0xff]  ;;  %v101_v18 = vsel %vm90_vm0, %v37_v9, 0  ;;  %v39_v19 = vld [vmem:[%s4889_s1 + $0x28] sm:$0xff]  ;;  %v44_v20 = vld [vmem:[%s4890_s5 + $0x10] sm:$0xff] }
   0x4   :  { %v4242_v10 = vand.u32 4294901760, %v92_v6  ;;  %v4248_v13 = vpack.c.bf16 %v119_v5, %v116_v4  ;;  %v4250_v14 = vsub.f32 %v32_v0, %v116_v4  ;;  %v4252_v15 = vsub.f32 %v33_v1, %v119_v5  ;;  %v42_v17 = vld [vmem:[%s4890_s5] sm:$0xff]  ;;  %v40_v24 = vld [vmem:[%s4889_s1 + $0x30] sm:$0xff]  ;;  %v43_v25 = vld [vmem:[%s4890_s5 + $0x8] sm:$0xff]  ;;  %62 = vperm.xlu1 %4168, %v44_v20  }
   0x5   :  { %52 = vperm.xlu0 %4167, %v42_v17   ;;  %v104_v23 = vsel %vm90_vm0, %v38_v12, 0  ;;  %v4276_v26 = vand.u32 4294901760, %v95_v11  ;;  %v4278_v27 = vand.u32 4294901760, %v98_v16  ;;  %v45_v28 = vld [vmem:[%s4890_s5 + $0x18] sm:$0xff]  ;;  %v4290_v31 = vand.u32 4294901760, %v101_v18  ;;  %v46_v42 = vld [vmem:[%s4890_s5 + $0x20] sm:$0xff] }
   0x6   :  { %3339 = vmatprep.mubr.f32.mxu0 %v4242_v10  ;;  %v265_v21 = vand.u32 4294901760, %v4250_v14  ;;  %v272_v22 = vand.u32 4294901760, %v4252_v15  ;;  %3782 = vmatprep.subr.bf16.mxu1 %v4248_v13  ;;  %v107_v32 = vsel %vm90_vm0, %v39_v19, 0  ;;  %v4296_v34 = vand.u32 4294901760, %v104_v23  ;;  %v41_v39 = vld [vmem:[%s4889_s1 + $0x38] sm:$0xff]  ;;  %v47_v51 = vld [vmem:[%s4890_s5 + $0x28] sm:$0xff] }
   0x7   :  { %3784 = vmatpush3.bf16.msra.mxu1 %v4248_v13  ;;  %v4294_v33 = vsub.f32 %v95_v11, %v4276_v26  ;;  %v110_v35 = vsel %vm90_vm0, %v40_v24, 0  ;;  %v4300_v36 = vsub.f32 %v92_v6, %v4242_v10  ;;  %v4306_v40 = vsub.f32 %v98_v16, %v4278_v27  ;;  %v48_v60 = vld [vmem:[%s4890_s5 + $0x30] sm:$0xff]  ;;  %v907_v8 = vld [vmem:[%s4891_s6] sm:$0xff]  ;;  %v49_v9 = vld [vmem:[%s4890_s5 + $0x38] sm:$0xff] }
   0x8   :  { %v266_v29 = vsub.f32 %v4250_v14, %v265_v21  ;;  %v273_v30 = vsub.f32 %v4252_v15, %v272_v22  ;;  %v4309_v41 = vsub.f32 %v101_v18, %v4290_v31  ;;  %67 = vperm.xlu1 %4168, %v45_v28   ;;  %v3789_v43 = vpack.c.bf16 %v4252_v15, %v4250_v14  ;;  %v909_v19 = vld [vmem:[%s4891_s6 + $0x10] sm:$0xff]  ;;  %v908_v20 = vld [vmem:[%s4891_s6 + $0x8] sm:$0xff]  ;;  %v910_v28 = vld [vmem:[%s4891_s6 + $0x18] sm:$0xff] }
   0x9   :  { %57 = vperm.xlu0 %4167, %v43_v25   ;;  %v4316_v44 = vand.u32 4294901760, %v107_v32  ;;  %v4319_v45 = vsub.f32 %v104_v23, %v4296_v34  ;;  %v184_v46 = vand.u32 4294901760, %v4300_v36  ;;  %v194_v48 = vand.u32 4294901760, %v4294_v33  ;;  %v911_v25 = vld [vmem:[%s4891_s6 + $0x20] sm:$0xff]  ;;  %v1848_v14 = vld [vmem:[%s4892_s7 + $0x10] sm:$0xff]  ;;  %v1847_v15 = vld [vmem:[%s4892_s7 + $0x8] sm:$0xff] }
   0xa   :  { %v267_v37 = vand.u32 4294901760, %v266_v29  ;;  %v274_v38 = vand.u32 4294901760, %v273_v30  ;;  %v204_v49 = vand.u32 4294901760, %v4306_v40  ;;  %v214_v50 = vand.u32 4294901760, %v4309_v41  ;;  %v913_v29 = vld [vmem:[%s4891_s6 + $0x30] sm:$0xff]  ;;  %v912_v30 = vld [vmem:[%s4891_s6 + $0x28] sm:$0xff] }
   0xb   :  { %v4328_v52 = vand.u32 4294901760, %v110_v35  ;;  %v113_v53 = vsel %vm90_vm0, %v41_v39, 0  ;;  %v224_v54 = vand.u32 4294901760, %v4319_v45  ;;  %v185_v55 = vsub.f32 %v4300_v36, %v184_v46 }
   0xc   :  { %v3785_v47 = vpack.c.bf16 %v274_v38, %v267_v37  ;;  %v4336_v56 = vsub.f32 %v107_v32, %v4316_v44  ;;  %v195_v57 = vsub.f32 %v4294_v33, %v194_v48  ;;  %v205_v58 = vsub.f32 %v4306_v40, %v204_v49  ;;  %77 = vperm.xlu1 %4168, %v47_v51   ;;  %v914_v37 = vld [vmem:[%s4891_s6 + $0x38] sm:$0xff]  ;;  %v903_v51 = vld [vmem:[%s4894_s2 + $0x20] sm:$0xff] }
   0xd   :  { %72 = vperm.xlu0 %4167, %v46_v42   ;;  %v215_v59 = vsub.f32 %v4309_v41, %v214_v50  ;;  %v4351_v61 = vsub.f32 %v110_v35, %v4328_v52  ;;  %v186_v62 = vand.u32 4294901760, %v185_v55  ;;  %v225_v63 = vsub.f32 %v4319_v45, %v224_v54  ;;  %v1846_v35 = vld [vmem:[%s4892_s7] sm:$0xff] }
   0xe   :  { %3786 = vmatprep.subr.bf16.mxu0 %v3785_v47  ;;  %v4356_v0 = vand.u32 4294901760, %v113_v53  ;;  %v234_v1 = vand.u32 4294901760, %v4336_v56  ;;  %v196_v2 = vand.u32 4294901760, %v195_v57  ;;  %v206_v3 = vand.u32 4294901760, %v205_v58 }
   0xf   :  { %3788 = vmatpush3.bf16.msra.mxu0 %v3785_v47  ;;  %v244_v4 = vand.u32 4294901760, %v4351_v61  ;;  %3323 = vmatprep.mubr.f32.mxu1 %v186_v62  ;;  %v216_v6 = vand.u32 4294901760, %v215_v59  ;;  %v226_v11 = vand.u32 4294901760, %v225_v63  ;;  %v3797_v32 = vpack.c.bf16 %v272_v22, %v265_v21  ;;  %v2561_v21 = vld [vmem:[%s4893_s8] sm:$0xff]  ;;  %v1849_v22 = vld [vmem:[%s4892_s7 + $0x18] sm:$0xff]  ;;  %v905_v63 = vld [vmem:[%s4894_s2 + $0x30] sm:$0xff] }
  0x10   :  { %3790 = vmatprep.subr.bf16.mxu0 %v3789_v43  ;;  %v4362_v5 = vsub.f32 %v113_v53, %v4356_v0  ;;  %3324 = vmatmul.mubr.f32.vlgmr.msra.gmra.mrb[0].mxu1 %v196_v2  ;;  %v235_v7 = vsub.f32 %v4336_v56, %v234_v1  ;;  %v969_v55 = vsel %vm955_vm1, %v903_v51, 0 }
  0x11   :  { %82 = vperm.xlu0 %4167, %v48_v60   ;;  %v245_v12 = vsub.f32 %v4351_v61, %v244_v4  ;;  %3326 = vmatprep.mubr.f32.mxu1 %v206_v3 }
  0x12   :  { %3340 = vmatmul.mubr.f32.vlgmr.msra.gmra.mrb[0].mxu0 %v4276_v26  ;;  %v254_v16 = vand.u32 4294901760, %v4362_v5  ;;  %87 = vperm.xlu1 %4168, %v49_v9   ;;  %v236_v17 = vand.u32 4294901760, %v235_v7 }
  0x13   :  { %3792 = vmatpush3.bf16.msra.mxu0 %v3789_v43  ;;  %3342 = vmatprep.mubr.f32.mxu0 %v4278_v27  ;;  %v246_v23 = vand.u32 4294901760, %v245_v12 }
  0x14   :  { %3794 = vmatprep.subr.bf16.mxu0 %v4248_v13  ;;  %3327 = vmatmul.mubr.f32.gmra.mrb[2].mxu1 %v216_v6  ;;  %v255_v18 = vsub.f32 %v4362_v5, %v254_v16  ;;  %v906_v6 = vld [vmem:[%s4894_s2 + $0x38] sm:$0xff] }
  0x15   :  { %917 = vperm.xlu0 %4167, %v907_v8   ;;  %3329 = vmatprep.mubr.f32.mxu1 %v226_v11  ;;  %v978_v12 = vsel %vm955_vm1, %v906_v6, 0 }
  0x16   :  { %3343 = vmatmul.mubr.f32.gmra.mrb[2].mxu0 %v4290_v31  ;;  %922 = vperm.xlu1 %4168, %v908_v20   ;;  %v256_v24 = vand.u32 4294901760, %v255_v18 }
  0x17   :  { %3345 = vmatprep.mubr.f32.mxu0 %v4296_v34 }
  0x18   :  { %3330 = vmatmul.mubr.f32.gmra.mrb[4].mxu1 %v236_v17 }
  0x19   :  { %927 = vperm.xlu0 %4167, %v909_v19   ;;  %3332 = vmatprep.mubr.f32.mxu1 %v246_v23 }
  0x1a   :  { %3346 = vmatmul.mubr.f32.gmra.mrb[4].mxu0 %v4316_v44  ;;  %932 = vperm.xlu1 %4168, %v910_v28   ;;  %v4558_v28 = vand.u32 4294901760, %v978_v12 }
  0x1b   :  { %3348 = vmatprep.mubr.f32.mxu0 %v4328_v52 }
  0x1c   :  { %3333 = vmatmul.mubr.f32.gmra.mrb[6].mxu1 %v256_v24 }
  0x1d   :  { %937 = vperm.xlu0 %4167, %v911_v25  }
  0x1e   :  { %3349 = vmatmul.mubr.f32.gmra.mrb[6].mxu0 %v4356_v0  ;;  %942 = vperm.xlu1 %4168, %v912_v30  }
  0x1f   :  { %3355 = vmatprep.mubr.f32.mxu0 %v4300_v36 }
  0x21   :  { %947 = vperm.xlu0 %4167, %v913_v29  }
  0x22   :  { %3356 = vmatmul.mubr.f32.vlgmr.msra.gmra.mrb[0].mxu0 %v4294_v33  ;;  %952 = vperm.xlu1 %4168, %v914_v37  }
  0x23   :  { %3796 = vmatpush3.bf16.msra.mxu0 %v4248_v13  ;;  %3358 = vmatprep.mubr.f32.mxu0 %v4306_v40 }
  0x24   :  { %3798 = vmatprep.subr.bf16.mxu0 %v3797_v32 }
  0x25   :  { %1852 = vperm.xlu0 %4167, %v1846_v35  }
  0x26   :  { %3359 = vmatmul.mubr.f32.gmra.mrb[2].mxu0 %v4309_v41  ;;  %1857 = vperm.xlu1 %4168, %v1847_v15  }
  0x27   :  { %3361 = vmatprep.mubr.f32.mxu0 %v4319_v45  ;;  %v900_v45 = vld [vmem:[%s4894_s2 + $0x8] sm:$0xff] }
  0x28   :  { %v960_v47 = vsel %vm955_vm1, %v900_v45, 0  ;;  %v4577_v45 = vsub.f32 %v978_v12, %v4558_v28 }
  0x29   :  { %1862 = vperm.xlu0 %4167, %v1848_v14  }
  0x2a   :  { %3362 = vmatmul.mubr.f32.gmra.mrb[4].mxu0 %v4336_v56  ;;  %1867 = vperm.xlu1 %4168, %v1849_v22   ;;  %v904_v56 = vld [vmem:[%s4894_s2 + $0x28] sm:$0xff] }
  0x2b   :  { %3364 = vmatprep.mubr.f32.mxu0 %v4351_v61  ;;  %v4520_v61 = vand.u32 4294901760, %v969_v55  ;;  %v972_v62 = vsel %vm955_vm1, %v904_v56, 0 }
  0x2d   :  { %2564 = vperm.xlu0 %4167, %v2561_v21   ;;  %v4538_v8 = vsub.f32 %v969_v55, %v4520_v61 }
  0x2e   :  { %3365 = vmatmul.mubr.f32.gmra.mrb[6].mxu0 %v4362_v5  ;;  %v975_v5 = vsel %vm955_vm1, %v905_v63, 0 }
  0x2f   :  { %3371 = vmatprep.mubr.f32.mxu0 %v184_v46  ;;  %v901_v46 = vld [vmem:[%s4894_s2 + $0x10] sm:$0xff]  ;;  %v4545_v11 = vand.u32 4294901760, %v975_v5  ;;  %v4898_v20 = vand.u32 4294901760, %v4538_v8 }
  0x31   :  { %v4562_v37 = vsub.f32 %v975_v5, %v4545_v11 }
  0x32   :  { %3372 = vmatmul.mubr.f32.vlgmr.msra.gmra.mrb[0].mxu0 %v194_v48  ;;  %v963_v48 = vsel %vm955_vm1, %v901_v46, 0 }
  0x33   :  { %3800 = vmatpush3.bf16.msra.mxu0 %v3797_v32  ;;  %3374 = vmatprep.mubr.f32.mxu0 %v204_v49  ;;  %v902_v49 = vld [vmem:[%s4894_s2 + $0x18] sm:$0xff] }
  0x34   :  { %3802 = vmatprep.subr.bf16.mxu0 %v4248_v13  ;;  %v966_v53 = vsel %vm955_vm1, %v902_v49, 0 }
  0x35   :  { %v4518_v60 = vand.u32 4294901760, %v966_v53 }
  0x36   :  { %3375 = vmatmul.mubr.f32.gmra.mrb[2].mxu0 %v214_v50  ;;  %v4500_v50 = vand.u32 4294901760, %v960_v47 }
  0x37   :  { %3377 = vmatprep.mubr.f32.mxu0 %v224_v54  ;;  %v4529_v3 = vsub.f32 %v966_v53, %v4518_v60 }
  0x38   :  { %v4513_v58 = vsub.f32 %v960_v47, %v4500_v50 }
  0x39   :  { %v1085_v17 = vand.u32 4294901760, %v4529_v3 }
  0x3a   :  { %3378 = vmatmul.mubr.f32.gmra.mrb[4].mxu0 %v234_v1 }
  0x3b   :  { %3380 = vmatprep.mubr.f32.mxu0 %v244_v4  ;;  %v4531_v4 = vand.u32 4294901760, %v972_v62  ;;  %v4568_v21 = vsub.f32 %v4529_v3, %v1085_v17 }
  0x3d   :  { %v4555_v18 = vsub.f32 %v972_v62, %v4531_v4 }
  0x3e   :  { %3381 = vmatmul.mubr.f32.gmra.mrb[6].mxu0 %v254_v16 }
  0x3f   :  { %3387 = vmatprep.mubr.f32.mxu0 %v4242_v10  ;;  %v1105_v22 = vand.u32 4294901760, %v4555_v18 }
  0x42   :  { %3388 = vmatmul.mubr.f32.vlgmr.msra.gmra.mrb[0].mxu0 %v4276_v26 }
  0x43   :  { %3804 = vmatpush3.bf16.msra.mxu0 %v4248_v13  ;;  %3390 = vmatprep.mubr.f32.mxu0 %v4278_v27  ;;  %v899_v13 = vld [vmem:[%s4894_s2] sm:$0xff] }
  0x46   :  { %3391 = vmatmul.mubr.f32.gmra.mrb[2].mxu0 %v4290_v31 }
  0x47   :  { %3393 = vmatprep.mubr.f32.mxu0 %v4296_v34 }
  0x4a   :  { %3394 = vmatmul.mubr.f32.gmra.mrb[4].mxu0 %v4316_v44 }
  0x4b   :  { %3396 = vmatprep.mubr.f32.mxu0 %v4328_v52 }
  0x4e   :  { %3397 = vmatmul.mubr.f32.gmra.mrb[6].mxu0 %v4356_v0 }
  0x4f   :  { %3403 = vmatprep.mubr.f32.mxu0 %v4242_v10  ;;  %v957_v10 = vsel %vm955_vm1, %v899_v13, 0 }
  0x52   :  { %3404 = vmatmul.mubr.f32.vlgmr.msra.gmra.mrb[0].mxu0 %v4276_v26  ;;  %v4474_v26 = vand.u32 4294901760, %v957_v10 }
  0x53   :  { %3406 = vmatprep.mubr.f32.mxu0 %v4278_v27 }
  0x54   :  { %v4477_v27 = vsub.f32 %v957_v10, %v4474_v26 }
  0x56   :  { %3407 = vmatmul.mubr.f32.gmra.mrb[2].mxu0 %v4290_v31  ;;  %v1055_v31 = vand.u32 4294901760, %v4477_v27 }
  0x57   :  { %3409 = vmatprep.mubr.f32.mxu0 %v4296_v34 }
  0x58   :  { %v1056_v33 = vsub.f32 %v4477_v27, %v1055_v31 }
  0x5a   :  { %3410 = vmatmul.mubr.f32.gmra.mrb[4].mxu0 %v4316_v44  ;;  %v1057_v34 = vand.u32 4294901760, %v1056_v33  ;;  %v4574_v33 = vsub.f32 %v4538_v8, %v4898_v20 }
  0x5b   :  { %3412 = vmatprep.mubr.f32.mxu0 %v4328_v52  ;;  %v4505_v52 = vand.u32 4294901760, %v963_v48 }
  0x5c   :  { %3431 = vmatprep.mubr.f32.mxu1 %v1057_v34 }
  0x5d   :  { %v4516_v59 = vsub.f32 %v963_v48, %v4505_v52 }
  0x5e   :  { %3413 = vmatmul.mubr.f32.gmra.mrb[6].mxu0 %v4356_v0  ;;  %v1065_v0 = vand.u32 4294901760, %v4513_v58 }
  0x5f   :  { %v1075_v2 = vand.u32 4294901760, %v4516_v59 }
  0x60   :  { %v4543_v9 = vsub.f32 %v4513_v58, %v1065_v0 }
  0x61   :  { %v4551_v16 = vsub.f32 %v4516_v59, %v1075_v2 }
  0x62   :  { %v1067_v35 = vand.u32 4294901760, %v4543_v9 }
  0x63   :  { %v1077_v15 = vand.u32 4294901760, %v4551_v16 }
  0x83   :  { %v63_v54 = vpop.permute.xlu1 %62 }
  0x84   :  { %v53_v57 = vpop.permute.xlu0 %52 }
  0x87   :  { %v68_v1 = vpop.permute.xlu1 %67 }
  0x88   :  { %v58_v7 = vpop.permute.xlu0 %57 }
  0x8b   :  { %v78_v23 = vpop.permute.xlu1 %77 }
  0x8c   :  { %v73_v29 = vpop.permute.xlu0 %72 }
  0x90   :  { %v83_v62 = vpop.permute.xlu0 %82 }
  0x91   :  { %v88_v51 = vpop.permute.xlu1 %87 }
  0xe3   :  { %v3325_v36 = vpop.f32.mrb[0].mxu1 }
  0xe4   :  { %v188_v38 = vpop.f32.mrb[1].mxu1  ;;  %v199_v19 = vadd.f32 %v3325_v36, %v58_v7 }
  0xe5   :  { %v189_v24 = vadd.f32 %v188_v38, %v53_v57 }
  0xe7   :  { %v3328_v39 = vpop.f32.mrb[2].mxu1 }
  0xe8   :  { %v208_v40 = vpop.f32.mrb[3].mxu1  ;;  %v219_v13 = vadd.f32 %v3328_v39, %v68_v1  ;;  %v1115_v39 = vand.u32 4294901760, %v4562_v37 }
  0xe9   :  { %v209_v34 = vadd.f32 %v208_v40, %v63_v54 }
  0xea   :  { %v1116_v9 = vsub.f32 %v4562_v37, %v1115_v39 }
  0xeb   :  { %v3331_v41 = vpop.f32.mrb[4].mxu1 }
  0xec   :  { %v4483_v42 = vpop.f32.mrb[5].mxu1  ;;  %v239_v46 = vadd.f32 %v3331_v41, %v78_v23 }
  0xed   :  { %v229_v53 = vadd.f32 %v4483_v42, %v73_v29 }
  0xef   :  { %v4485_v43 = vpop.f32.mrb[6].mxu1 }
  0xf0   :  { %v4487_v44 = vpop.f32.mrb[7].mxu1  ;;  %v259_v40 = vadd.f32 %v4485_v43, %v88_v51 }
  0xf1   :  { %v249_v1 = vadd.f32 %v4487_v44, %v83_v62 }
 0x125   :  { %v3405_v25 = vpop.f32.mrb[0].mxu0 }
 0x126   :  { %v4034_v30 = vadd.f32 %v3405_v25, %v199_v19  ;;  %v829_v32 = vpop.f32.mrb[1].mxu0 }
 0x127   :  { %v4036_v14 = vadd.f32 %v829_v32, %v189_v24 }
 0x128   :  { %vm876_vm2 = vcmp.gt.f32.partialorder %v4034_v30, 0.0  ;;  %v884_v10 = vmul.f32 0.01, %v4034_v30 }
 0x129   :  { %vm875_vm3 = vcmp.gt.f32.partialorder %v4036_v14, 0.0  ;;  %v883_v36 = vmul.f32 0.01, %v4036_v14  ;;  %v3408_v38 = vpop.f32.mrb[2].mxu0 }
 0x12a   :  { %v892_v47 = vsel %vm876_vm2, %v4034_v30, %v884_v10  ;;  %v4038_v48 = vadd.f32 %v3408_v38, %v219_v13  ;;  %v841_v49 = vpop.f32.mrb[3].mxu0  ;;  %vm4171_vm2 = vmmov 0  }
 0x12b   :  { %v984_v55 = vand.u32 4294901760, %v892_v47  ;;  %v891_v56 = vsel %vm875_vm3, %v4036_v14, %v883_v36  ;;  %v4040_v57 = vadd.f32 %v841_v49, %v209_v34  ;;  %vm2567_vm3 = vcmask 261120  }
 0x12c   :  { %v981_v54 = vand.u32 4294901760, %v891_v56  ;;  %vm878_vm4 = vcmp.gt.f32.partialorder %v4038_v48, 0.0  ;;  %v886_v63 = vmul.f32 0.01, %v4038_v48 }
 0x12d   :  { %v4583_v41 = vsub.f32 %v892_v47, %v984_v55  ;;  %vm877_vm5 = vcmp.gt.f32.partialorder %v4040_v57, 0.0  ;;  %v885_v5 = vmul.f32 0.01, %v4040_v57  ;;  %v3411_v6 = vpop.f32.mrb[4].mxu0 }
 0x12e   :  { %v4585_v7 = vpack.c.bf16 %v984_v55, %v981_v54  ;;  %v4587_v12 = vsub.f32 %v891_v56, %v981_v54  ;;  %v894_v42 = vsel %vm878_vm4, %v4038_v48, %v886_v63  ;;  %v4042_v19 = vadd.f32 %v3411_v6, %v239_v46  ;;  %v853_v23 = vpop.f32.mrb[5].mxu0 }
 0x12f   :  { %v990_v24 = vand.u32 4294901760, %v894_v42  ;;  %v893_v25 = vsel %vm877_vm5, %v4040_v57, %v885_v5  ;;  %v4044_v43 = vadd.f32 %v853_v23, %v229_v53  ;;  %v1143_v29 = vand.u32 4294901760, %v4583_v41 }
 0x130   :  { %v987_v30 = vand.u32 4294901760, %v893_v25  ;;  %vm880_vm6 = vcmp.gt.f32.partialorder %v4042_v19, 0.0  ;;  %v888_v44 = vmul.f32 0.01, %v4042_v19  ;;  %3806 = vmatprep.subr.bf16.mxu1 %v4585_v7  ;;  %v1136_v32 = vand.u32 4294901760, %v4587_v12 }
 0x131   :  { %v1156_v14 = vsub.f32 %v894_v42, %v990_v24  ;;  %vm879_vm7 = vcmp.gt.f32.partialorder %v4044_v43, 0.0  ;;  %v887_v13 = vmul.f32 0.01, %v4044_v43  ;;  %v3414_v10 = vpop.f32.mrb[6].mxu0  ;;  %3808 = vmatpush3.bf16.msra.mxu1 %v4585_v7  ;;  %v1144_v34 = vsub.f32 %v4583_v41, %v1143_v29 }
 0x132   :  { %v4594_v36 = vpack.c.bf16 %v990_v24, %v987_v30  ;;  %v1149_v38 = vsub.f32 %v893_v25, %v987_v30  ;;  %v896_v46 = vsel %vm880_vm6, %v4042_v19, %v888_v44  ;;  %v4046_v47 = vadd.f32 %v3414_v10, %v259_v40  ;;  %v865_v48 = vpop.f32.mrb[7].mxu0 }
 0x133   :  { %v996_v49 = vand.u32 4294901760, %v896_v46  ;;  %v895_v51 = vsel %vm879_vm7, %v4044_v43, %v887_v13  ;;  %v4048_v53 = vadd.f32 %v865_v48, %v249_v1  ;;  %v1137_v55 = vsub.f32 %v4587_v12, %v1136_v32 }
 0x134   :  { %v993_v56 = vand.u32 4294901760, %v895_v51  ;;  %vm882_vm8 = vcmp.gt.f32.partialorder %v4046_v47, 0.0  ;;  %v890_v57 = vmul.f32 0.01, %v4046_v47  ;;  %3810 = vmatprep.subr.bf16.mxu1 %v4594_v36  ;;  %v1145_v62 = vand.u32 4294901760, %v1144_v34 }
 0x135   :  { %v1170_v54 = vsub.f32 %v896_v46, %v996_v49  ;;  %vm881_vm9 = vcmp.gt.f32.partialorder %v4048_v53, 0.0  ;;  %v889_v63 = vmul.f32 0.01, %v4048_v53  ;;  %3812 = vmatpush3.bf16.msra.mxu1 %v4594_v36  ;;  %v1138_v5 = vand.u32 4294901760, %v1137_v55 }
 0x136   :  { %v4599_v6 = vpack.c.bf16 %v996_v49, %v993_v56  ;;  %v1163_v40 = vsub.f32 %v895_v51, %v993_v56  ;;  %v898_v42 = vsel %vm882_vm8, %v4046_v47, %v890_v57  ;;  %v1150_v19 = vand.u32 4294901760, %v1149_v38 }
 0x137   :  { %v1002_v1 = vand.u32 4294901760, %v898_v42  ;;  %v897_v23 = vsel %vm881_vm9, %v4048_v53, %v889_v63  ;;  %v3821_v24 = vpack.c.bf16 %v1145_v62, %v1138_v5  ;;  %v1157_v25 = vand.u32 4294901760, %v1156_v14 }
 0x138   :  { %v999_v43 = vand.u32 4294901760, %v897_v23  ;;  %3814 = vmatprep.subr.bf16.mxu1 %v4599_v6  ;;  %v1151_v30 = vsub.f32 %v1149_v38, %v1150_v19  ;;  %v1164_v44 = vand.u32 4294901760, %v1163_v40  ;;  %v1171_v13 = vand.u32 4294901760, %v1170_v54 }
 0x139   :  { %v1184_v10 = vsub.f32 %v898_v42, %v1002_v1  ;;  %3816 = vmatpush3.bf16.msra.mxu1 %v4599_v6  ;;  %v1158_v34 = vsub.f32 %v1156_v14, %v1157_v25  ;;  %v3837_v46 = vpack.c.bf16 %v4583_v41, %v4587_v12  ;;  %v3841_v48 = vpack.c.bf16 %v1156_v14, %v1149_v38 }
 0x13a   :  { %v4605_v47 = vpack.c.bf16 %v1002_v1, %v999_v43  ;;  %v1177_v49 = vsub.f32 %v897_v23, %v999_v43  ;;  %v1152_v51 = vand.u32 4294901760, %v1151_v30  ;;  %v1165_v53 = vsub.f32 %v1163_v40, %v1164_v44 }
 0x13b   :  { %v1159_v55 = vand.u32 4294901760, %v1158_v34  ;;  %v1172_v56 = vsub.f32 %v1170_v54, %v1171_v13  ;;  %v1185_v57 = vand.u32 4294901760, %v1184_v10  ;;  %v3845_v62 = vpack.c.bf16 %v1170_v54, %v1163_v40 }
 0x13c   :  { %3818 = vmatprep.subr.bf16.mxu1 %v4605_v47  ;;  %v1166_v63 = vand.u32 4294901760, %v1165_v53  ;;  %v1178_v5 = vand.u32 4294901760, %v1177_v49  ;;  %v3849_v42 = vpack.c.bf16 %v1184_v10, %v1177_v49  ;;  %v4608_v20 = vpack.c.bf16 %v1143_v29, %v1136_v32 }
 0x13d   :  { %3820 = vmatpush3.bf16.msra.mxu1 %v4605_v47  ;;  %v3825_v41 = vpack.c.bf16 %v1159_v55, %v1152_v51  ;;  %v1173_v12 = vand.u32 4294901760, %v1172_v56  ;;  %v1186_v14 = vsub.f32 %v1184_v10, %v1185_v57  ;;  %v4611_v38 = vpack.c.bf16 %v1157_v25, %v1150_v19 }
 0x13e   :  { %3822 = vmatprep.subr.bf16.mxu1 %v3821_v24  ;;  %v1179_v1 = vsub.f32 %v1177_v49, %v1178_v5  ;;  %v4613_v23 = vpack.c.bf16 %v1171_v13, %v1164_v44  ;;  %v4615_v43 = vpack.c.bf16 %v1185_v57, %v1178_v5  ;;  %v1087_v29 = vand.u32 4294901760, %v4568_v21 }
 0x13f   :  { %v3829_v54 = vpack.c.bf16 %v1173_v12, %v1166_v63  ;;  %v1187_v40 = vand.u32 4294901760, %v1186_v14  ;;  %v1106_v32 = vsub.f32 %v4555_v18, %v1105_v22  ;;  %v1125_v19 = vand.u32 4294901760, %v4577_v45 }
 0x140   :  { %3432 = vmatmul.mubr.f32.vlgmr.msra.gmra.mrb[8].mxu1 %v1067_v35  ;;  %v1180_v30 = vand.u32 4294901760, %v1179_v1  ;;  %v1097_v25 = vand.u32 4294901760, %v4574_v33 }
 0x141   :  { %3824 = vmatpush3.bf16.msra.mxu1 %v3821_v24  ;;  %3434 = vmatprep.mubr.f32.mxu1 %v1077_v15  ;;  %v1107_v21 = vand.u32 4294901760, %v1106_v32  ;;  %v1126_v44 = vsub.f32 %v4577_v45, %v1125_v19  ;;  %v1117_v24 = vand.u32 4294901760, %v1116_v9 }
 0x142   :  { %3826 = vmatprep.subr.bf16.mxu1 %v3825_v41  ;;  %v3833_v35 = vpack.c.bf16 %v1187_v40, %v1180_v30 }
 0x143   :  { %v1127_v16 = vand.u32 4294901760, %v1126_v44 }
 0x144   :  { %3435 = vmatmul.mubr.f32.gmra.mrb[10].mxu1 %v1087_v29 }
 0x145   :  { %3828 = vmatpush3.bf16.msra.mxu1 %v3825_v41  ;;  %3437 = vmatprep.mubr.f32.mxu1 %v1097_v25 }
 0x146   :  { %3830 = vmatprep.subr.bf16.mxu1 %v3829_v54 }
 0x148   :  { %3438 = vmatmul.mubr.f32.gmra.mrb[12].mxu1 %v1107_v21 }
 0x149   :  { %3832 = vmatpush3.bf16.msra.mxu1 %v3829_v54  ;;  %3440 = vmatprep.mubr.f32.mxu1 %v1117_v24 }
 0x14a   :  { %3834 = vmatprep.subr.bf16.mxu1 %v3833_v35 }
 0x14c   :  { %3441 = vmatmul.mubr.f32.gmra.mrb[14].mxu1 %v1127_v16 }
 0x14d   :  { %3836 = vmatpush3.bf16.msra.mxu1 %v3833_v35  ;;  %3459 = vmatprep.mubr.f32.mxu1 %v4474_v26 }
 0x14e   :  { %3838 = vmatprep.subr.bf16.mxu1 %v3837_v46 }
 0x150   :  { %3460 = vmatmul.mubr.f32.vlgmr.msra.gmra.mrb[8].mxu1 %v4500_v50 }
 0x151   :  { %3840 = vmatpush3.bf16.msra.mxu1 %v3837_v46  ;;  %3462 = vmatprep.mubr.f32.mxu1 %v4505_v52 }
 0x152   :  { %3842 = vmatprep.subr.bf16.mxu1 %v3841_v48 }
 0x154   :  { %3463 = vmatmul.mubr.f32.gmra.mrb[10].mxu1 %v4518_v60 }
 0x155   :  { %3844 = vmatpush3.bf16.msra.mxu1 %v3841_v48  ;;  %3465 = vmatprep.mubr.f32.mxu1 %v4520_v61 }
 0x156   :  { %3846 = vmatprep.subr.bf16.mxu1 %v3845_v62 }
 0x158   :  { %3466 = vmatmul.mubr.f32.gmra.mrb[12].mxu1 %v4531_v4 }
 0x159   :  { %3848 = vmatpush3.bf16.msra.mxu1 %v3845_v62  ;;  %3468 = vmatprep.mubr.f32.mxu1 %v4545_v11 }
 0x15a   :  { %3850 = vmatprep.subr.bf16.mxu1 %v3849_v42 }
 0x15c   :  { %3469 = vmatmul.mubr.f32.gmra.mrb[14].mxu1 %v4558_v28 }
 0x15d   :  { %3852 = vmatpush3.bf16.msra.mxu1 %v3849_v42  ;;  %3487 = vmatprep.mubr.f32.mxu1 %v4477_v27  ;;  %v4899_v27 = vand.u32 4294901760, %v4538_v8 }
 0x15e   :  { %3854 = vmatprep.subr.bf16.mxu1 %v4585_v7 }
 0x160   :  { %3488 = vmatmul.mubr.f32.vlgmr.msra.gmra.mrb[8].mxu1 %v4513_v58 }
 0x161   :  { %3856 = vmatpush3.bf16.msra.mxu1 %v4585_v7  ;;  %3490 = vmatprep.mubr.f32.mxu1 %v4516_v59 }
 0x162   :  { %3858 = vmatprep.subr.bf16.mxu1 %v4594_v36 }
 0x164   :  { %3491 = vmatmul.mubr.f32.gmra.mrb[10].mxu1 %v4529_v3 }
 0x165   :  { %3860 = vmatpush3.bf16.msra.mxu1 %v4594_v36  ;;  %3493 = vmatprep.mubr.f32.mxu1 %v4538_v8 }
 0x166   :  { %3862 = vmatprep.subr.bf16.mxu1 %v4599_v6 }
 0x168   :  { %3494 = vmatmul.mubr.f32.gmra.mrb[12].mxu1 %v4555_v18 }
 0x169   :  { %3864 = vmatpush3.bf16.msra.mxu1 %v4599_v6  ;;  %3496 = vmatprep.mubr.f32.mxu1 %v4562_v37 }
 0x16a   :  { %3866 = vmatprep.subr.bf16.mxu1 %v4605_v47 }
 0x16c   :  { %3497 = vmatmul.mubr.f32.gmra.mrb[14].mxu1 %v4577_v45 }
 0x16d   :  { %3868 = vmatpush3.bf16.msra.mxu1 %v4605_v47  ;;  %3515 = vmatprep.mubr.f32.mxu1 %v1055_v31  ;;  %v1842_v31 = vld [vmem:[%s4895_s3] sm:$0xff] }
 0x16e   :  { %3870 = vmatprep.subr.bf16.mxu1 %v4608_v20 }
 0x170   :  { %3516 = vmatmul.mubr.f32.vlgmr.msra.gmra.mrb[8].mxu1 %v1065_v0 }
 0x171   :  { %3872 = vmatpush3.bf16.msra.mxu1 %v4608_v20  ;;  %3518 = vmatprep.mubr.f32.mxu1 %v1075_v2  ;;  %v1844_v2 = vld [vmem:[%s4895_s3 + $0x10] sm:$0xff]  ;;  %v918_v20 = vpop.permute.xlu0 %917 }
 0x172   :  { %3874 = vmatprep.subr.bf16.mxu1 %v4611_v38  ;;  %v1877_v8 = vsel %vm955_vm1, %v1844_v2, 0 }
 0x174   :  { %3519 = vmatmul.mubr.f32.gmra.mrb[10].mxu1 %v1085_v17  ;;  %v923_v17 = vpop.permute.xlu1 %922 }
 0x175   :  { %3876 = vmatpush3.bf16.msra.mxu1 %v4611_v38  ;;  %3521 = vmatprep.mubr.f32.mxu1 %v4899_v27 }
 0x176   :  { %3878 = vmatprep.subr.bf16.mxu1 %v4613_v23 }
 0x178   :  { %3522 = vmatmul.mubr.f32.gmra.mrb[12].mxu1 %v1105_v22  ;;  %v933_v33 = vpop.permute.xlu1 %932 }
 0x179   :  { %3880 = vmatpush3.bf16.msra.mxu1 %v4613_v23  ;;  %3524 = vmatprep.mubr.f32.mxu1 %v1115_v39 }
 0x17a   :  { %3882 = vmatprep.subr.bf16.mxu1 %v4615_v43 }
 0x17c   :  { %3525 = vmatmul.mubr.f32.gmra.mrb[14].mxu1 %v1125_v19  ;;  %v943_v56 = vpop.permute.xlu1 %942 }
 0x17d   :  { %3884 = vmatpush3.bf16.msra.mxu1 %v4615_v43  ;;  %3543 = vmatprep.mubr.f32.mxu1 %v4474_v26 }
 0x17e   :  { %3886 = vmatprep.subr.bf16.mxu1 %v4585_v7 }
 0x180   :  { %3544 = vmatmul.mubr.f32.vlgmr.msra.gmra.mrb[8].mxu1 %v4500_v50  ;;  %v953_v16 = vpop.permute.xlu1 %952 }
 0x181   :  { %3888 = vmatpush3.bf16.msra.mxu1 %v4585_v7  ;;  %3546 = vmatprep.mubr.f32.mxu1 %v4505_v52  ;;  %v928_v7 = vpop.permute.xlu0 %927 }
 0x182   :  { %3890 = vmatprep.subr.bf16.mxu1 %v4594_v36 }
 0x184   :  { %3547 = vmatmul.mubr.f32.gmra.mrb[10].mxu1 %v4518_v60 }
 0x185   :  { %3892 = vmatpush3.bf16.msra.mxu1 %v4594_v36  ;;  %3549 = vmatprep.mubr.f32.mxu1 %v4520_v61  ;;  %v938_v42 = vpop.permute.xlu0 %937 }
 0x186   :  { %3894 = vmatprep.subr.bf16.mxu1 %v4599_v6 }
 0x188   :  { %3550 = vmatmul.mubr.f32.gmra.mrb[12].mxu1 %v4531_v4 }
 0x189   :  { %3896 = vmatpush3.bf16.msra.mxu1 %v4599_v6  ;;  %3552 = vmatprep.mubr.f32.mxu1 %v4545_v11 }
 0x18a   :  { %3898 = vmatprep.subr.bf16.mxu1 %v4605_v47 }
 0x18c   :  { %3553 = vmatmul.mubr.f32.gmra.mrb[14].mxu1 %v4558_v28 }
 0x18d   :  { %3900 = vmatpush3.bf16.msra.mxu1 %v4605_v47  ;;  %3571 = vmatprep.mubr.f32.mxu1 %v4474_v26  ;;  %v1871_v26 = vsel %vm955_vm1, %v1842_v31, 0 }
 0x18e   :  { %v4709_v58 = vand.u32 4294901760, %v1871_v26 }
 0x190   :  { %3572 = vmatmul.mubr.f32.vlgmr.msra.gmra.mrb[8].mxu1 %v4500_v50  ;;  %v4712_v50 = vsub.f32 %v1871_v26, %v4709_v58  ;;  %3621 = vmatprep.mubr.f32.mxu0 %v4709_v58 }
 0x191   :  { %3574 = vmatprep.mubr.f32.mxu1 %v4505_v52 }
 0x192   :  { %v1957_v52 = vand.u32 4294901760, %v4712_v50 }
 0x194   :  { %3575 = vmatmul.mubr.f32.gmra.mrb[10].mxu1 %v4518_v60  ;;  %v1958_v59 = vsub.f32 %v4712_v50, %v1957_v52 }
 0x195   :  { %3577 = vmatprep.mubr.f32.mxu1 %v4520_v61  ;;  %v1843_v61 = vld [vmem:[%s4895_s3 + $0x8] sm:$0xff] }
 0x196   :  { %v1959_v60 = vand.u32 4294901760, %v1958_v59  ;;  %v1874_v0 = vsel %vm955_vm1, %v1843_v61, 0 }
 0x197   :  { %v4726_v3 = vand.u32 4294901760, %v1874_v0 }
 0x198   :  { %3578 = vmatmul.mubr.f32.gmra.mrb[12].mxu1 %v4531_v4  ;;  %v1845_v4 = vld [vmem:[%s4895_s3 + $0x18] sm:$0xff] }
 0x199   :  { %3580 = vmatprep.mubr.f32.mxu1 %v4545_v11  ;;  %v1880_v11 = vsel %vm955_vm1, %v1845_v4, 0  ;;  %v4734_v18 = vsub.f32 %v1874_v0, %v4726_v3 }
 0x19a   :  { %v4738_v37 = vand.u32 4294901760, %v1880_v11 }
 0x19b   :  { %v1967_v15 = vand.u32 4294901760, %v4734_v18 }
 0x19c   :  { %3581 = vmatmul.mubr.f32.gmra.mrb[14].mxu1 %v4558_v28  ;;  %v4736_v28 = vand.u32 4294901760, %v1877_v8  ;;  %v4745_v39 = vsub.f32 %v1880_v11, %v4738_v37 }
 0x19d   :  { %3599 = vmatprep.mubr.f32.mxu1 %v1959_v60  ;;  %v4750_v10 = vsub.f32 %v4734_v18, %v1967_v15  ;;  %v948_v60 = vpop.permute.xlu0 %947 }
 0x19e   :  { %v4742_v22 = vsub.f32 %v1877_v8, %v4736_v28  ;;  %v1987_v49 = vand.u32 4294901760, %v4745_v39 }
 0x19f   :  { %v1969_v5 = vand.u32 4294901760, %v4750_v10 }
 0x1a0   :  { %v1977_v46 = vand.u32 4294901760, %v4742_v22  ;;  %v4765_v43 = vsub.f32 %v4745_v39, %v1987_v49 }
 0x1a2   :  { %v4758_v14 = vsub.f32 %v4742_v22, %v1977_v46 }
 0x263   :  { %v3573_v45 = vpop.f32.mrb[8].mxu1 }
 0x264   :  { %v4049_v36 = vadd.f32 %v3573_v45, %v923_v17  ;;  %v1772_v6 = vpop.f32.mrb[9].mxu1 }
 0x265   :  { %v4050_v13 = vadd.f32 %v1772_v6, %v918_v20 }
 0x266   :  { %vm1819_vm10 = vcmp.gt.f32.partialorder %v4049_v36, 0.0  ;;  %v1827_v34 = vmul.f32 0.01, %v4049_v36 }
 0x267   :  { %vm1818_vm11 = vcmp.gt.f32.partialorder %v4050_v13, 0.0  ;;  %v1826_v48 = vmul.f32 0.01, %v4050_v13  ;;  %v3576_v47 = vpop.f32.mrb[10].mxu1 }
 0x268   :  { %v1835_v51 = vsel %vm1819_vm10, %v4049_v36, %v1827_v34  ;;  %v4051_v53 = vadd.f32 %v3576_v47, %v933_v33  ;;  %v1784_v55 = vpop.f32.mrb[11].mxu1 }
 0x269   :  { %v1886_v57 = vand.u32 4294901760, %v1835_v51  ;;  %v1834_v62 = vsel %vm1818_vm11, %v4050_v13, %v1826_v48  ;;  %v4052_v63 = vadd.f32 %v1784_v55, %v928_v7 }
 0x26a   :  { %v1883_v41 = vand.u32 4294901760, %v1834_v62  ;;  %vm1821_vm12 = vcmp.gt.f32.partialorder %v4051_v53, 0.0  ;;  %v1829_v12 = vmul.f32 0.01, %v4051_v53 }
 0x26b   :  { %v4760_v38 = vsub.f32 %v1835_v51, %v1886_v57  ;;  %vm1820_vm13 = vcmp.gt.f32.partialorder %v4052_v63, 0.0  ;;  %v1828_v1 = vmul.f32 0.01, %v4052_v63  ;;  %v3579_v23 = vpop.f32.mrb[12].mxu1 }
 0x26c   :  { %v4767_v54 = vpack.c.bf16 %v1886_v57, %v1883_v41  ;;  %v4769_v40 = vsub.f32 %v1834_v62, %v1883_v41  ;;  %v1837_v29 = vsel %vm1821_vm12, %v4051_v53, %v1829_v12  ;;  %v4053_v32 = vadd.f32 %v3579_v23, %v943_v56  ;;  %v1796_v30 = vpop.f32.mrb[13].mxu1 }
 0x26d   :  { %v1892_v19 = vand.u32 4294901760, %v1837_v29  ;;  %v1836_v25 = vsel %vm1820_vm13, %v4052_v63, %v1828_v1  ;;  %v4054_v9 = vadd.f32 %v1796_v30, %v938_v42  ;;  %v2005_v35 = vand.u32 4294901760, %v4760_v38 }
 0x26e   :  { %v1889_v21 = vand.u32 4294901760, %v1836_v25  ;;  %vm1823_vm14 = vcmp.gt.f32.partialorder %v4053_v32, 0.0  ;;  %v1831_v44 = vmul.f32 0.01, %v4053_v32  ;;  %3902 = vmatprep.subr.bf16.mxu1 %v4767_v54  ;;  %v1998_v24 = vand.u32 4294901760, %v4769_v40 }
 0x26f   :  { %v4774_v27 = vsub.f32 %v1837_v29, %v1892_v19  ;;  %vm1822_vm15 = vcmp.gt.f32.partialorder %v4054_v9, 0.0  ;;  %v1830_v31 = vmul.f32 0.01, %v4054_v9  ;;  %v3582_v26 = vpop.f32.mrb[14].mxu1  ;;  %3904 = vmatpush3.bf16.msra.mxu1 %v4767_v54  ;;  %v2006_v59 = vsub.f32 %v4760_v38, %v2005_v35 }
 0x270   :  { %v4780_v61 = vpack.c.bf16 %v1892_v19, %v1889_v21  ;;  %v2011_v0 = vsub.f32 %v1836_v25, %v1889_v21  ;;  %v1839_v2 = vsel %vm1823_vm14, %v4053_v32, %v1831_v44  ;;  %v4055_v4 = vadd.f32 %v3582_v26, %v953_v16  ;;  %v1808_v8 = vpop.f32.mrb[15].mxu1 }
 0x271   :  { %v1898_v11 = vand.u32 4294901760, %v1839_v2  ;;  %v1838_v17 = vsel %vm1822_vm15, %v4054_v9, %v1830_v31  ;;  %v4056_v20 = vadd.f32 %v1808_v8, %v948_v60  ;;  %v1999_v33 = vsub.f32 %v4769_v40, %v1998_v24 }
 0x272   :  { %v1895_v45 = vand.u32 4294901760, %v1838_v17  ;;  %vm1825_vm0 = vcmp.gt.f32.partialorder %v4055_v4, 0.0  ;;  %v1833_v7 = vmul.f32 0.01, %v4055_v4  ;;  %3906 = vmatprep.subr.bf16.mxu1 %v4780_v61  ;;  %v2007_v36 = vand.u32 4294901760, %v2006_v59 }
 0x273   :  { %v2032_v6 = vsub.f32 %v1839_v2, %v1898_v11  ;;  %vm1824_vm1 = vcmp.gt.f32.partialorder %v4056_v20, 0.0  ;;  %v1832_v13 = vmul.f32 0.01, %v4056_v20  ;;  %3908 = vmatpush3.bf16.msra.mxu1 %v4780_v61  ;;  %v2000_v34 = vand.u32 4294901760, %v1999_v33 }
 0x274   :  { %v4787_v48 = vpack.c.bf16 %v1898_v11, %v1895_v45  ;;  %v2025_v47 = vsub.f32 %v1838_v17, %v1895_v45  ;;  %v1841_v51 = vsel %vm1825_vm0, %v4055_v4, %v1833_v7  ;;  %v2012_v53 = vand.u32 4294901760, %v2011_v0 }
 0x275   :  { %v1904_v55 = vand.u32 4294901760, %v1841_v51  ;;  %v1840_v56 = vsel %vm1824_vm1, %v4056_v20, %v1832_v13  ;;  %v3917_v57 = vpack.c.bf16 %v2007_v36, %v2000_v34  ;;  %v2019_v62 = vand.u32 4294901760, %v4774_v27 }
 0x276   :  { %v1901_v63 = vand.u32 4294901760, %v1840_v56  ;;  %3910 = vmatprep.subr.bf16.mxu1 %v4787_v48  ;;  %v2013_v42 = vsub.f32 %v2011_v0, %v2012_v53  ;;  %v2026_v41 = vand.u32 4294901760, %v2025_v47  ;;  %v2033_v12 = vand.u32 4294901760, %v2032_v6 }
 0x277   :  { %v2046_v1 = vsub.f32 %v1841_v51, %v1904_v55  ;;  %3918 = vmatprep.subr.bf16.mxu0 %v3917_v57  ;;  %3912 = vmatpush3.bf16.msra.mxu1 %v4787_v48  ;;  %v2020_v23 = vsub.f32 %v4774_v27, %v2019_v62  ;;  %v1979_v29 = vand.u32 4294901760, %v4758_v14  ;;  %v3933_v32 = vpack.c.bf16 %v4760_v38, %v4769_v40 }
 0x278   :  { %v4796_v30 = vpack.c.bf16 %v1904_v55, %v1901_v63  ;;  %v2039_v19 = vsub.f32 %v1840_v56, %v1901_v63  ;;  %3920 = vmatpush3.bf16.msra.mxu0 %v3917_v57  ;;  %v2014_v25 = vand.u32 4294901760, %v2013_v42  ;;  %v2027_v9 = vsub.f32 %v2025_v47, %v2026_v41 }
 0x279   :  { %v2021_v21 = vand.u32 4294901760, %v2020_v23  ;;  %v2034_v44 = vsub.f32 %v2032_v6, %v2033_v12  ;;  %v2047_v16 = vand.u32 4294901760, %v2046_v1  ;;  %v3937_v31 = vpack.c.bf16 %v4774_v27, %v2011_v0 }
 0x27a   :  { %3914 = vmatprep.subr.bf16.mxu1 %v4796_v30  ;;  %v2028_v26 = vand.u32 4294901760, %v2027_v9  ;;  %v2040_v59 = vand.u32 4294901760, %v2039_v19  ;;  %v3941_v60 = vpack.c.bf16 %v2032_v6, %v2025_v47  ;;  %v3945_v14 = vpack.c.bf16 %v2046_v1, %v2039_v19 }
 0x27b   :  { %v3921_v2 = vpack.c.bf16 %v2021_v21, %v2014_v25  ;;  %3916 = vmatpush3.bf16.msra.mxu1 %v4796_v30  ;;  %v2035_v4 = vand.u32 4294901760, %v2034_v44  ;;  %v2048_v8 = vsub.f32 %v2046_v1, %v2047_v16  ;;  %v3965_v11 = vpack.c.bf16 %v2005_v35, %v1998_v24 }
 0x27c   :  { %v2041_v17 = vsub.f32 %v2039_v19, %v2040_v59  ;;  %v3969_v20 = vpack.c.bf16 %v2019_v62, %v2012_v53  ;;  %v3973_v33 = vpack.c.bf16 %v2033_v12, %v2026_v41  ;;  %v3977_v27 = vpack.c.bf16 %v2047_v16, %v2040_v59 }
 0x27d   :  { %3922 = vmatprep.subr.bf16.mxu0 %v3921_v2  ;;  %v3925_v0 = vpack.c.bf16 %v2035_v4, %v2028_v26  ;;  %v2049_v45 = vand.u32 4294901760, %v2048_v8  ;;  %v1989_v7 = vand.u32 4294901760, %v4765_v43 }
 0x27e   :  { %3924 = vmatpush3.bf16.msra.mxu0 %v3921_v2  ;;  %3600 = vmatmul.mubr.f32.vlgmr.msra.gmra.mrb[16].mxu1 %v1969_v5  ;;  %v2042_v36 = vand.u32 4294901760, %v2041_v17 }
 0x27f   :  { %3926 = vmatprep.subr.bf16.mxu0 %v3925_v0  ;;  %3602 = vmatprep.mubr.f32.mxu1 %v1979_v29 }
 0x280   :  { %v3929_v40 = vpack.c.bf16 %v2049_v45, %v2042_v36 }
 0x282   :  { %3928 = vmatpush3.bf16.msra.mxu0 %v3925_v0  ;;  %3603 = vmatmul.mubr.f32.gmra.mrb[18].mxu1 %v1989_v7 }
 0x283   :  { %3930 = vmatprep.subr.bf16.mxu0 %v3929_v40 }
 0x286   :  { %3932 = vmatpush3.bf16.msra.mxu0 %v3929_v40 }
 0x287   :  { %3934 = vmatprep.subr.bf16.mxu0 %v3933_v32 }
 0x289   :  { %3622 = vmatmul.mubr.f32.vlgmr.msra.gmra.mrb[8].mxu0 %v4726_v3 }
 0x28a   :  { %3936 = vmatpush3.bf16.msra.mxu0 %v3933_v32  ;;  %3624 = vmatprep.mubr.f32.mxu0 %v4736_v28 }
 0x28b   :  { %3938 = vmatprep.subr.bf16.mxu0 %v3937_v31 }
 0x28d   :  { %3625 = vmatmul.mubr.f32.gmra.mrb[10].mxu0 %v4738_v37 }
 0x28e   :  { %3940 = vmatpush3.bf16.msra.mxu0 %v3937_v31  ;;  %3643 = vmatprep.mubr.f32.mxu0 %v4712_v50  ;;  %v4170_v50 = vmov 0.0|0.0  }
 0x28f   :  { %3942 = vmatprep.subr.bf16.mxu0 %v3941_v60  ;;  %4003 = vmatprep.subr.bf16.mxu1 %v4170_v50 }
 0x292   :  { %3944 = vmatpush3.bf16.msra.mxu0 %v3941_v60 }
 0x293   :  { %3946 = vmatprep.subr.bf16.mxu0 %v3945_v14 }
 0x296   :  { %3948 = vmatpush3.bf16.msra.mxu0 %v3945_v14 }
 0x297   :  { %3950 = vmatprep.subr.bf16.mxu0 %v4767_v54 }
 0x299   :  { %3644 = vmatmul.mubr.f32.vlgmr.msra.gmra.mrb[8].mxu0 %v4734_v18 }
 0x29a   :  { %3952 = vmatpush3.bf16.msra.mxu0 %v4767_v54  ;;  %3646 = vmatprep.mubr.f32.mxu0 %v4742_v22  ;;  %v1858_v22 = vpop.permute.xlu1 %1857 }
 0x29b   :  { %3954 = vmatprep.subr.bf16.mxu0 %v4780_v61 }
 0x29d   :  { %3647 = vmatmul.mubr.f32.gmra.mrb[10].mxu0 %v4745_v39  ;;  %v1853_v39 = vpop.permute.xlu0 %1852 }
 0x29e   :  { %3956 = vmatpush3.bf16.msra.mxu0 %v4780_v61  ;;  %3665 = vmatprep.mubr.f32.mxu0 %v1957_v52  ;;  %v4172_v52 = vmov 0.0  }
 0x29f   :  { %3958 = vmatprep.subr.bf16.mxu0 %v4787_v48  ;;  %3734 = vmatprep.mubr.msk.f32.mxu1 %vm4171_vm2, %v4172_v52 }
 0x2a2   :  { %3960 = vmatpush3.bf16.msra.mxu0 %v4787_v48 }
 0x2a3   :  { %3962 = vmatprep.subr.bf16.mxu0 %v4796_v30 }
 0x2a6   :  { %3964 = vmatpush3.bf16.msra.mxu0 %v4796_v30 }
 0x2a7   :  { %3966 = vmatprep.subr.bf16.mxu0 %v3965_v11 }
 0x2a9   :  { %3666 = vmatmul.mubr.f32.vlgmr.msra.gmra.mrb[8].mxu0 %v1967_v15 }
 0x2aa   :  { %3968 = vmatpush3.bf16.msra.mxu0 %v3965_v11  ;;  %3668 = vmatprep.mubr.f32.mxu0 %v1977_v46 }
 0x2ab   :  { %3970 = vmatprep.subr.bf16.mxu0 %v3969_v20 }
 0x2ad   :  { %3669 = vmatmul.mubr.f32.gmra.mrb[10].mxu0 %v1987_v49 }
 0x2ae   :  { %3972 = vmatpush3.bf16.msra.mxu0 %v3969_v20  ;;  %3687 = vmatprep.mubr.f32.mxu0 %v4709_v58 }
 0x2af   :  { %3974 = vmatprep.subr.bf16.mxu0 %v3973_v33 }
 0x2b2   :  { %3976 = vmatpush3.bf16.msra.mxu0 %v3973_v33 }
 0x2b3   :  { %3978 = vmatprep.subr.bf16.mxu0 %v3977_v27 }
 0x2b6   :  { %3980 = vmatpush3.bf16.msra.mxu0 %v3977_v27 }
 0x2b7   :  { %3982 = vmatprep.subr.bf16.mxu0 %v4767_v54 }
 0x2b9   :  { %3688 = vmatmul.mubr.f32.vlgmr.msra.gmra.mrb[8].mxu0 %v4726_v3 }
 0x2ba   :  { %3984 = vmatpush3.bf16.msra.mxu0 %v4767_v54  ;;  %3690 = vmatprep.mubr.f32.mxu0 %v4736_v28  ;;  %v1868_v54 = vpop.permute.xlu1 %1867 }
 0x2bb   :  { %3986 = vmatprep.subr.bf16.mxu0 %v4780_v61 }
 0x2bd   :  { %3691 = vmatmul.mubr.f32.gmra.mrb[10].mxu0 %v4738_v37 }
 0x2be   :  { %3988 = vmatpush3.bf16.msra.mxu0 %v4780_v61  ;;  %3709 = vmatprep.mubr.f32.mxu0 %v4709_v58  ;;  %v1863_v61 = vpop.permute.xlu0 %1862 }
 0x2bf   :  { %3990 = vmatprep.subr.bf16.mxu0 %v4787_v48 }
 0x2c2   :  { %3992 = vmatpush3.bf16.msra.mxu0 %v4787_v48 }
 0x2c3   :  { %3994 = vmatprep.subr.bf16.mxu0 %v4796_v30 }
 0x2c6   :  { %3996 = vmatpush3.bf16.msra.mxu0 %v4796_v30 }
 0x2c7   :  { %3997 = vmatprep.subr.bf16.mxu0 %v4170_v50 }
 0x2c9   :  { %3710 = vmatmul.mubr.f32.vlgmr.msra.gmra.mrb[8].mxu0 %v4726_v3 }
 0x2ca   :  { %3712 = vmatprep.mubr.f32.mxu0 %v4736_v28  ;;  %v2560_v28 = vld [vmem:[%s4896_s4] sm:$0xff] }
 0x2cd   :  { %3713 = vmatmul.mubr.f32.gmra.mrb[10].mxu0 %v4738_v37  ;;  %v2569_v37 = vsel %vm2567_vm3, %v2560_v28, 0 }
 0x2ce   :  { %3723 = vmatprep.mubr.msk.f32.mxu0 %vm4171_vm2, %v4172_v52  ;;  %v4856_v10 = vand.u32 4294901760, %v2569_v37 }
 0x2d0   :  { %v4859_v24 = vsub.f32 %v2569_v37, %v4856_v10 }
 0x2d2   :  { %v2642_v63 = vand.u32 4294901760, %v4859_v24 }
 0x2d4   :  { %v2643_v9 = vsub.f32 %v4859_v24, %v2642_v63 }
 0x2d6   :  { %v2644_v8 = vand.u32 4294901760, %v2643_v9 }
 0x351   :  { %v3601_v58 = vpop.f32.mrb[16].mxu1 }
 0x352   :  { %v1961_v18 = vpop.f32.mrb[17].mxu1  ;;  %v1972_v46 = vadd.f32 %v3601_v58, %v1858_v22 }
 0x353   :  { %v1962_v49 = vadd.f32 %v1961_v18, %v1853_v39 }
 0x355   :  { %v3604_v3 = vpop.f32.mrb[18].mxu1 }
 0x356   :  { %v1981_v15 = vpop.f32.mrb[19].mxu1  ;;  %v1992_v6 = vadd.f32 %v3604_v3, %v1868_v54 }
 0x357   :  { %v1982_v34 = vadd.f32 %v1981_v15, %v1863_v61  ;;  %v2565_v15 = vpop.permute.xlu0 %2564 }
 0x39c   :  { %v3711_v5 = vpop.f32.mrb[8].mxu0 }
 0x39d   :  { %v4058_v38 = vadd.f32 %v3711_v5, %v1972_v46  ;;  %v2526_v43 = vpop.f32.mrb[9].mxu0 }
 0x39e   :  { %v4060_v35 = vadd.f32 %v2526_v43, %v1962_v49 }
 0x39f   :  { %vm2549_vm4 = vcmp.gt.f32.partialorder %v4058_v38, 0.0  ;;  %v2553_v13 = vmul.f32 0.01, %v4058_v38 }
 0x3a0   :  { %vm2548_vm5 = vcmp.gt.f32.partialorder %v4060_v35, 0.0  ;;  %v2552_v48 = vmul.f32 0.01, %v4060_v35  ;;  %v3714_v47 = vpop.f32.mrb[10].mxu0 }
 0x3a1   :  { %v2557_v51 = vsel %vm2549_vm4, %v4058_v38, %v2553_v13  ;;  %v4062_v53 = vadd.f32 %v3714_v47, %v1992_v6  ;;  %v2538_v55 = vpop.f32.mrb[11].mxu0 }
 0x3a2   :  { %v2575_v56 = vand.u32 4294901760, %v2557_v51  ;;  %v2556_v57 = vsel %vm2548_vm5, %v4060_v35, %v2552_v48  ;;  %v4064_v62 = vadd.f32 %v2538_v55, %v1982_v34 }
 0x3a3   :  { %v2572_v42 = vand.u32 4294901760, %v2556_v57  ;;  %vm2551_vm6 = vcmp.gt.f32.partialorder %v4062_v53, 0.0  ;;  %v2555_v41 = vmul.f32 0.01, %v4062_v53 }
 0x3a4   :  { %v2659_v12 = vsub.f32 %v2557_v51, %v2575_v56  ;;  %vm2550_vm7 = vcmp.gt.f32.partialorder %v4064_v62, 0.0  ;;  %v2554_v1 = vmul.f32 0.01, %v4064_v62 }
 0x3a5   :  { %v2652_v23 = vsub.f32 %v2556_v57, %v2572_v42  ;;  %v2559_v29 = vsel %vm2551_vm6, %v4062_v53, %v2555_v41  ;;  %v3998_v32 = vpack.c.bf16 %v2575_v56, %v2572_v42 }
 0x3a6   :  { %v2660_v30 = vand.u32 4294901760, %v2659_v12  ;;  %v2581_v19 = vand.u32 4294901760, %v2559_v29  ;;  %v2558_v25 = vsel %vm2550_vm7, %v4064_v62, %v2554_v1 }
 0x3a7   :  { %v2653_v21 = vand.u32 4294901760, %v2652_v23  ;;  %v2578_v44 = vand.u32 4294901760, %v2558_v25  ;;  %3999 = vmatpush3.bf16.msra.mxu0 %v3998_v32  ;;  %v4010_v16 = vpack.c.bf16 %v2659_v12, %v2652_v23 }
 0x3a8   :  { %v2673_v31 = vsub.f32 %v2559_v29, %v2581_v19  ;;  %4000 = vmatprep.subr.bf16.mxu0 %v4170_v50  ;;  %v2661_v26 = vsub.f32 %v2659_v12, %v2660_v30 }
 0x3a9   :  { %v2666_v59 = vsub.f32 %v2558_v25, %v2578_v44  ;;  %v4001_v60 = vpack.c.bf16 %v2581_v19, %v2578_v44  ;;  %v2654_v14 = vsub.f32 %v2652_v23, %v2653_v21  ;;  %v4022_v2 = vpack.c.bf16 %v2660_v30, %v2653_v21 }
 0x3aa   :  { %v2674_v4 = vand.u32 4294901760, %v2673_v31  ;;  %v2662_v11 = vand.u32 4294901760, %v2661_v26 }
 0x3ab   :  { %v2667_v17 = vand.u32 4294901760, %v2666_v59  ;;  %4002 = vmatpush3.bf16.msra.mxu0 %v4001_v60  ;;  %v2655_v20 = vand.u32 4294901760, %v2654_v14  ;;  %v4013_v33 = vpack.c.bf16 %v2673_v31, %v2666_v59 }
 0x3ac   :  { %v2675_v27 = vsub.f32 %v2673_v31, %v2674_v4 }
 0x3ad   :  { %v4004_v0 = vpack.c.bf16 %v2662_v11, %v2655_v20  ;;  %v2668_v45 = vsub.f32 %v2666_v59, %v2667_v17  ;;  %v4025_v7 = vpack.c.bf16 %v2674_v4, %v2667_v17 }
 0x3ae   :  { %3724 = vmatmul.mubr.f32.vlgmr.msra.gmra.mrb[12].mxu0 %v2644_v8  ;;  %v2676_v36 = vand.u32 4294901760, %v2675_v27 }
 0x3af   :  { %4005 = vmatpush3.bf16.msra.mxu1 %v4004_v0  ;;  %v2669_v40 = vand.u32 4294901760, %v2668_v45 }
 0x3b0   :  { %4006 = vmatprep.subr.bf16.mxu1 %v4170_v50 }
 0x3b1   :  { %v4007_v58 = vpack.c.bf16 %v2676_v36, %v2669_v40 }
 0x3b3   :  { %4008 = vmatpush3.bf16.msra.mxu1 %v4007_v58 }
 0x3b4   :  { %4009 = vmatprep.subr.bf16.mxu1 %v4170_v50 }
 0x3b6   :  { %3735 = vmatmul.mubr.f32.vlgmr.msra.gmra.mrb[20].mxu1 %v4856_v10 }
 0x3b7   :  { %4011 = vmatpush3.bf16.msra.mxu1 %v4010_v16  ;;  %3745 = vmatprep.mubr.msk.f32.mxu1 %vm4171_vm2, %v4172_v52 }
 0x3b8   :  { %4012 = vmatprep.subr.bf16.mxu1 %v4170_v50 }
 0x3bb   :  { %4014 = vmatpush3.bf16.msra.mxu1 %v4013_v33 }
 0x3bc   :  { %4015 = vmatprep.subr.bf16.mxu1 %v4170_v50 }
 0x3be   :  { %3746 = vmatmul.mubr.f32.vlgmr.msra.gmra.mrb[20].mxu1 %v4859_v24 }
 0x3bf   :  { %4017 = vmatpush3.bf16.msra.mxu1 %v3998_v32  ;;  %3756 = vmatprep.mubr.msk.f32.mxu1 %vm4171_vm2, %v4172_v52 }
 0x3c0   :  { %4018 = vmatprep.subr.bf16.mxu1 %v4170_v50 }
 0x3c3   :  { %4020 = vmatpush3.bf16.msra.mxu1 %v4001_v60 }
 0x3c4   :  { %4021 = vmatprep.subr.bf16.mxu1 %v4170_v50 }
 0x3c6   :  { %3757 = vmatmul.mubr.f32.vlgmr.msra.gmra.mrb[20].mxu1 %v2642_v63 }
 0x3c7   :  { %4023 = vmatpush3.bf16.msra.mxu1 %v4022_v2  ;;  %3767 = vmatprep.mubr.msk.f32.mxu1 %vm4171_vm2, %v4172_v52 }
 0x3c8   :  { %4024 = vmatprep.subr.bf16.mxu1 %v4170_v50 }
 0x3cb   :  { %4026 = vmatpush3.bf16.msra.mxu1 %v4025_v7 }
 0x3cc   :  { %4027 = vmatprep.subr.bf16.mxu1 %v4170_v50 }
 0x3ce   :  { %3768 = vmatmul.mubr.f32.vlgmr.msra.gmra.mrb[20].mxu1 %v4856_v10 }
 0x3cf   :  { %4029 = vmatpush3.bf16.msra.mxu1 %v3998_v32  ;;  %3778 = vmatprep.mubr.msk.f32.mxu1 %vm4171_vm2, %v4172_v52 }
 0x3d0   :  { %4030 = vmatprep.subr.bf16.mxu1 %v4170_v50 }
 0x3d3   :  { %4032 = vmatpush3.bf16.msra.mxu1 %v4001_v60 }
 0x3d6   :  { %3779 = vmatmul.mubr.f32.vlgmr.msra.gmra.mrb[20].mxu1 %v4856_v10 }
 0x481   :  { %v2646_v18 = vpop.f32.mrb[12].mxu0 }
 0x482   :  { %v3725_v3 = vpop.f32.mrb[13].mxu0  ;;  %v2647_v28 = vadd.f32 %v2646_v18, %v2565_v15 }
 0x4a9   :  { %v3052_v37 = vpop.f32.mrb[20].mxu1 }
 0x4aa   :  { %v4066_v22 = vadd.f32 %v3052_v37, %v2647_v28  ;;  %v3780_v39 = vpop.f32.mrb[21].mxu1 }
 0x4ac   :  { %3056 = vst [vmem:[%s4897_s9] sm:$0xff] %v4066_v22 }

</bundles_post_ra>
